<compile_context>
chip_gen: v5e
topology: v5e:2x2
jax: 0.10.0
libtpu: 0.0.40
codegen_flags: <defaults>
</compile_context>

<pallas_src>
import jax
import jax.numpy as jnp
import numpy as np
from jax.experimental import pallas as pl
from jax.experimental.pallas import tpu as pltpu


# ---------------------------------------------------------------------------
# Kernels
# ---------------------------------------------------------------------------

def _sigmoid_range_kernel_scalar(x_ref, scale_ref, shift_ref, o_ref):
    """Scalar bounds: scale/shift are (1,1) SMEM scalars (no VMEM streams)."""
    x = x_ref[...].astype(jnp.float32)
    s = scale_ref[0, 0]     # f32 scalar from SMEM
    b = shift_ref[0, 0]     # f32 scalar from SMEM
    # sigmoid -> EUP (exp + reciprocal); mul/add -> VPU. HBM-bound either way.
    o_ref[...] = (jax.nn.sigmoid(x) * s + b).astype(o_ref.dtype)


def _sigmoid_range_kernel_channel(x_ref, scale_ref, shift_ref, o_ref):
    """Per-channel bounds: scale/shift are (TM,1) columns broadcast over lanes."""
    x = x_ref[...].astype(jnp.float32)
    s = scale_ref[...]      # (TM, 1) f32, broadcasts across the 128-lane axis
    b = shift_ref[...]      # (TM, 1) f32
    o_ref[...] = (jax.nn.sigmoid(x) * s + b).astype(o_ref.dtype)


# ---------------------------------------------------------------------------
# Tiling helpers
# ---------------------------------------------------------------------------

def _pick_tile(dim, target, align):
    """Largest tile <= target that is a multiple of `align`, or the full dim."""
    if dim <= target:
        return dim
    return max((target // align) * align, align)


def _vmem_budget(itemsize):
    """Generation-aware scoped-VMEM limit and per-tile byte budget."""
    try:
        cap = int(pltpu.get_tpu_info().vmem_capacity_bytes)
    except Exception:
        cap = 64 << 20  # conservative (v7x-sized) fallback
    # Explicit scoped limit: half of physical VMEM (64 MiB on v5e/v6e,
    # 32 MiB on v7x), capped at 96 MiB.
    vmem_limit = int(min(cap // 2, 96 << 20))
    # The 4 double-buffered tile slabs (input + output) get at most half of
    # the scoped limit; the rest is headroom for the (TM,1)->(TM,128)-padded
    # scale/shift buffers and internal scratch.
    tile_budget = max(vmem_limit // 8, 1 << 20)
    return vmem_limit, tile_budget


# ---------------------------------------------------------------------------
# Wrapper
# ---------------------------------------------------------------------------

def sigmoid_range_forward(x, low, high, *, tm_target=512):
    """x: (N, C, H, W); low/high: python floats or (C,) per-channel bounds."""
    N, C, H, W = x.shape
    dtype = x.dtype
    itemsize = jnp.dtype(dtype).itemsize

    M, K = N * C, H * W
    # Contiguous view for a default-layout NCHW array (no HBM copy).
    # TODO(synk): if x arrives with a non-default layout, this reshape will
    # materialize a copy outside the kernel (extra HBM pass, still correct).
    x2 = x.reshape(M, K)

    # Dtype-aware alignment: sublane 8 (f32) / 16 (bf16) / 32 (int8/fp8).
    sublane = 8 * max(1, 4 // itemsize)
    lane = 128

    vmem_limit, tile_budget = _vmem_budget(itemsize)

    TM = _pick_tile(M, tm_target, sublane)
    tk_target = max(lane, (tile_budget // max(TM * itemsize, 1)) // lane * lane)
    TK = _pick_tile(K, tk_target, lane)

    # v7x megacore: with 2 TCs/chip a 1x1 grid leaves one core idle — halve a
    # tile axis if possible so the "parallel" grid is splittable.
    if pl.cdiv(M, TM) == 1 and pl.cdiv(K, TK) == 1:
        if K >= 2 * lane:
            TK = _pick_tile(K, max(lane, ((K // 2) // lane) * lane), lane)
        elif M >= 2 * sublane:
            TM = _pick_tile(M, max(sublane, ((M // 2) // sublane) * sublane), sublane)

    # Grid: M tiles outer, K tiles INNER.  Keep K innermost — the per-row
    # scale/shift block index (i, 0) is then constant over the inner loop so
    # its DMA is skipped between consecutive grid steps.  Both axes parallel
    # (embarrassingly parallel elementwise op) for megacore sharding.
    grid = (pl.cdiv(M, TM), pl.cdiv(K, TK))

    scalar_bounds = isinstance(low, (int, float)) and isinstance(high, (int, float))

    if scalar_bounds:
        # Scalar path: (1,1) f32 scalars in SMEM -> no extra DMA streams.
        scale = jnp.full((1, 1), float(high) - float(low), dtype=jnp.float32)
        shift = jnp.full((1, 1), float(low), dtype=jnp.float32)
        kernel = _sigmoid_range_kernel_scalar
        in_specs = [
            pl.BlockSpec((TM, TK), lambda i, j: (i, j)),
            pl.BlockSpec(memory_space=pltpu.MemorySpace.SMEM),
            pl.BlockSpec(memory_space=pltpu.MemorySpace.SMEM),
        ]
    else:
        low_c = jnp.broadcast_to(
            jnp.asarray(low, dtype=jnp.float32).reshape(-1), (C,))
        high_c = jnp.broadcast_to(
            jnp.asarray(high, dtype=jnp.float32).reshape(-1), (C,))
        # Per-row (row = n*C + c) scale/shift columns, kept in f32.
        scale = jnp.tile(high_c - low_c, N).reshape(M, 1)
        shift = jnp.tile(low_c, N).reshape(M, 1)
        kernel = _sigmoid_range_kernel_channel
        in_specs = [
            pl.BlockSpec((TM, TK), lambda i, j: (i, j)),
            pl.BlockSpec((TM, 1), lambda i, j: (i, 0)),
            pl.BlockSpec((TM, 1), lambda i, j: (i, 0)),
        ]

    out = pl.pallas_call(
        kernel,
        out_shape=jax.ShapeDtypeStruct((M, K), dtype),
        grid=grid,
        in_specs=in_specs,
        out_specs=pl.BlockSpec((TM, TK), lambda i, j: (i, j)),
        compiler_params=pltpu.CompilerParams(
            dimension_semantics=("parallel", "parallel"),
            vmem_limit_bytes=vmem_limit,
        ),
    )(x2, scale, shift)

    return out.reshape(N, C, H, W)


# ---------------------------------------------------------------------------
# Pure-JAX reference (mirrors the PyTorch permute/apply/permute forward)
# ---------------------------------------------------------------------------

def sigmoid_range_ref(x, low, high):
    C = x.shape[1]
    low = jnp.broadcast_to(jnp.asarray(low, dtype=jnp.float32).reshape(-1), (C,))
    high = jnp.broadcast_to(jnp.asarray(high, dtype=jnp.float32).reshape(-1), (C,))
    xt = jnp.transpose(x, (0, 2, 3, 1)).astype(jnp.float32)   # NCHW -> NHWC
    out = jax.nn.sigmoid(xt) * (high - low) + low
    return jnp.transpose(out, (0, 3, 1, 2)).astype(x.dtype)   # NHWC -> NCHW


if __name__ == "__main__":
    # Small shapes consistent with the module: N=2, C=4, H=W=16.
    N, C, H, W = 2, 4, 16, 16
    key = jax.random.PRNGKey(0)
    kx, kl, kh = jax.random.split(key, 3)
    x = jax.random.normal(kx, (N, C, H, W), dtype=jnp.float32)
    # Per-channel bounds (the branch the PyTorch forward actually executes).
    low = -1.0 + 0.2 * jax.random.normal(kl, (C,), dtype=jnp.float32)
    high = 2.0 + 0.2 * jax.random.normal(kh, (C,), dtype=jnp.float32)

    # 1) Per-channel bounds (VMEM (TM,1) scale/shift path).
    out = jax.block_until_ready(sigmoid_range_forward(x, low, high))
    ref = jax.block_until_ready(sigmoid_range_ref(x, low, high))
    assert out.shape == (N, C, H, W), out.shape
    np.testing.assert_allclose(np.asarray(out), np.asarray(ref), rtol=1e-5, atol=1e-5)

    # 2) Scalar bounds (SMEM-scalar path, no side streams).
    out_s = jax.block_until_ready(sigmoid_range_forward(x, -1.0, 1.0))
    ref_s = jax.block_until_ready(sigmoid_range_ref(x, -1.0, 1.0))
    np.testing.assert_allclose(np.asarray(out_s), np.asarray(ref_s), rtol=1e-5, atol=1e-5)

    # 3) bf16 I/O (dtype-aware alignment; sigmoid+affine computed in f32).
    xb = x.astype(jnp.bfloat16)
    out_b = jax.block_until_ready(sigmoid_range_forward(xb, low, high))
    ref_b = jax.block_until_ready(sigmoid_range_ref(xb, low, high))
    np.testing.assert_allclose(np.asarray(out_b, dtype=np.float32),
                               np.asarray(ref_b, dtype=np.float32),
                               rtol=2e-2, atol=2e-2)

    print("KERNEL_OK")
</pallas_src>

<mosaic_0001>
module attributes {stable_mosaic.version = 11 : i64} {
  func.func @_sigmoid_range_kernel_channel(%arg0: i32, %arg1: i32, %arg2: memref<8x128xf32, #tpu.memory_space<vmem>>, %arg3: memref<8x1xf32, #tpu.memory_space<vmem>>, %arg4: memref<8x1xf32, #tpu.memory_space<vmem>>, %arg5: memref<8x128xf32, #tpu.memory_space<vmem>>) attributes {dimension_semantics = [#tpu.dimension_semantics<parallel>, #tpu.dimension_semantics<parallel>], iteration_bounds = array<i64: 1, 2>, scalar_prefetch = 0 : i64, scratch_operands = 0 : i64, tpu.core_type = #tpu.core_type<tc>, window_params = [{transform_indices = @transform_0, window_bounds = array<i64: 8, 128>}, {transform_indices = @transform_1, window_bounds = array<i64: 8, 1>}, {transform_indices = @transform_2, window_bounds = array<i64: 8, 1>}, {transform_indices = @transform_3, window_bounds = array<i64: 8, 128>}]} {
    %c0 = arith.constant 0 : index
    %c0_0 = arith.constant 0 : index
    %0 = vector.load %arg2[%c0, %c0_0] : memref<8x128xf32, #tpu.memory_space<vmem>>, vector<8x128xf32>
    %c0_1 = arith.constant 0 : index
    %c0_2 = arith.constant 0 : index
    %1 = vector.load %arg3[%c0_1, %c0_2] : memref<8x1xf32, #tpu.memory_space<vmem>>, vector<8x1xf32>
    %c0_3 = arith.constant 0 : index
    %c0_4 = arith.constant 0 : index
    %2 = vector.load %arg4[%c0_3, %c0_4] : memref<8x1xf32, #tpu.memory_space<vmem>>, vector<8x1xf32>
    %3 = arith.negf %0 : vector<8x128xf32>
    %4 = math.exp %3 : vector<8x128xf32>
    %cst = arith.constant 1.000000e+00 : f32
    %5 = vector.broadcast %cst : f32 to vector<8x128xf32>
    %6 = arith.addf %5, %4 : vector<8x128xf32>
    %7 = arith.divf %5, %6 : vector<8x128xf32>
    %8 = vector.broadcast %1 : vector<8x1xf32> to vector<8x128xf32>
    %9 = arith.mulf %7, %8 : vector<8x128xf32>
    %10 = vector.broadcast %2 : vector<8x1xf32> to vector<8x128xf32>
    %11 = arith.addf %9, %10 : vector<8x128xf32>
    %c0_5 = arith.constant 0 : index
    %c0_6 = arith.constant 0 : index
    %12 = vector.load %arg5[%c0_5, %c0_6] : memref<8x128xf32, #tpu.memory_space<vmem>>, vector<8x128xf32>
    tpu.vector_store %arg5[%c0_5, %c0_6], %11 {strides = array<i32>} : memref<8x128xf32, #tpu.memory_space<vmem>>, vector<8x128xf32>,
    return
  }
  func.func @transform_0(%arg0: i32, %arg1: i32) -> (i32, i32) {
    %c0_i32 = arith.constant 0 : i32
    return %arg0, %arg1 : i32, i32
  }
  func.func @transform_1(%arg0: i32, %arg1: i32) -> (i32, i32) {
    %c0_i32 = arith.constant 0 : i32
    %c0_i32_0 = arith.constant 0 : i32
    return %arg0, %c0_i32 : i32, i32
  }
  func.func @transform_2(%arg0: i32, %arg1: i32) -> (i32, i32) {
    %c0_i32 = arith.constant 0 : i32
    %c0_i32_0 = arith.constant 0 : i32
    return %arg0, %c0_i32 : i32, i32
  }
  func.func @transform_3(%arg0: i32, %arg1: i32) -> (i32, i32) {
    %c0_i32 = arith.constant 0 : i32
    return %arg0, %arg1 : i32, i32
  }
}

</mosaic_0001>

<bundles_post_ra>
// kernel: tpu_custom_call.1
= control target key start
LH: loop header
LB: loop body
LE: loop exit
PB: predicated region body
PF: predicated region fallthrough
CT: control target
= control target key end

     0   :  { %8 = vsyncpa [#allocation3], 0  ;;  %s665_s0 = inlined_call_operand.vmem [shape: f32[8,256], index: 0, kind: input, shape index: {}]   ;;  %s666_s1 = inlined_call_operand.vmem [shape: f32[8,1], index: 1, kind: input, shape index: {}]   ;;  %s667_s2 = inlined_call_operand.vmem [shape: f32[8,1], index: 2, kind: input, shape index: {}]   ;;  %s668_s3 = inlined_call_operand.hbm [shape: f32[8,256], index: 3, kind: output, shape index: {}]  }
   0x1   :  { %10 = vsyncpa [#allocation3 + $0x1], 0  ;;  %s562_s12 = smov 0   ;;  %s564_s13 = smov 0  }
   0x2   :  { %s566_s14 = smov 0   ;;  %s568_s15 = smov 0  }
   0x3   :  { %s570_s16 = smov 0   ;;  %s572_s17 = smov 0  }
   0x4 LB: > { %s386_s18 = sadd.s32 4294967295, %s539_s17   ;;  %s387_s19 = sadd.s32 4294967294, %s539_s17   ;;  %s539_s17 = sphi %s572_s17, %s16_s17   ;;  %s535_s16 = sphi %s570_s16, %s675_s16   ;;  %s531_s15 = sphi %s568_s15, %s674_s15   ;;  %s527_s14 = sphi %s566_s14, %s673_s14   ;;  %s523_s13 = sphi %s564_s13, %s672_s13   ;;  %s519_s12 = sphi %s562_s12, %s671_s12  }
   0x5   : > { %s25_s20 = sadd.s32 1, %s535_s16  ;;  %s117_s21 = sadd.s32 1, %s527_s14 }
   0x6   : > { %p26_p0 = scmp.ge.s32.totalorder %s25_s20, 2  ;;  %p127_p1 = scmp.ne.s32.totalorder %s527_s14, %s523_s13 }
   0x7   : > { %p128_p2 = scmp.eq.s32.totalorder %s386_s18, 1  ;;  %p133_p3 = scmp.ne.s32.totalorder %s523_s13, %s519_s12 }
   0x8   : > { %s677_s20 = smov (%p26_p0, %s25_s20), 0  ;;  %p134_p5 = scmp.eq.s32.totalorder %s387_s19, 1 }
   0x9   : > { %p602_p4 = por %p128_p2, %p127_p1  ;;  %s113_s23 = ssub.s32 %s535_s16, %s677_s20 }
   0xa   : > { %p392_p6 = scmp.ge.s32.totalorder %s539_s17, 1  ;;  %p115_p7 = scmp.eq.s32.totalorder %s113_s23, 0 }
   0xb   : > { %p609_p8 = por %p134_p5, %p133_p3  ;;  %p177_p9 = scmp.lt.s32.totalorder %s539_s17, 3 }
   0xc   : > { %s615_s25 = scalar_select %p115_p7, %s527_s14, %s117_s21  }
   0xd   : > { %p178_p10 = pnand %p392_p6, %p177_p9 }
   0xe   : > { %p214_p11 = scmp.lt.s32.totalorder (!%p178_p10), %s531_s15, 1  ;;  %s209_s8 = sand.u32 (!%p178_p10), 1, %s523_s13  }
   0xf   : > { %181 = sbr.rel (%p178_p10) target bundleno = 150 (0x96), region = 32  ;;  %s393_s9 = sshll.u32 (!%p178_p10), %s209_s8, 3 }
  0x10   : > { %s397_s10 = sshll.u32 (!%p178_p10), %s531_s15, 3  ;;  %s211_s21 = scalar_lea.vmem (!%p178_p10), [#allocation2], %s393_s9 }
  0x11   : > { %s276_s19 = scalar_lea.hbm (!%p178_p10), %s668_s3, %s397_s10  ;;  %s278_s23 = sshll.u32 (!%p178_p10), %s211_s21, 4  ;;  %s279_s23 = int_to_ptr.vmem [resolvable:$true] %s278_s23 }
  0x12   : > { %s280_s26 = sshll.u32 (!%p178_p10), %s276_s19, 4  ;;  %s264_s27 = scalar_lea.sflag (!%p178_p10), [#allocation3], %s209_s8  ;;  %s281_s26 = int_to_ptr.hbm [resolvable:$true] %s280_s26 }
  0x13   : > { %s475_s28 = sshra.s32 (!%p178_p10), %s281_s26, 4  ;;  %s476_s28 = int_to_ptr.hbm [resolvable:$true] %s475_s28 }
  0x14   : > { %v229_v0 = vld [vmem:[%s666_s1] sm:$0xff]  ;;  %v541_v1 = vmov 0   ;;  %s215_s30 = scalar_select %p214_p11, %s531_s15, 1 }
  0x15   : > { %456 = vset.pattern.permute.xlu0 %v541_v1  ;;  %v230_v2 = vld [vmem:[%s667_s2] sm:$0xff]  ;;  %s477_s15 = scalar_lea.hbm %s476_s28, 8  ;;  %p482_p1 = scmp.lt.s32.totalorder %s476_s28, %s668_s3 }
  0x16   : > { %252 = vperm.xlu0 %456, %v229_v0   ;;  %s394_s4 = sshll.u32 %s215_s30, 3  ;;  %p478_p12 = scmp.ne.s32.totalorder %s476_s28, %s477_s15 }
  0x17   : > { %s219_s7 = scalar_lea.vmem %s665_s0, %s394_s4  ;;  %s481_s4 = scalar_lea.hbm %s668_s3, 16 }
  0x18   : > { %v228_v3 = vld [vmem:[%s219_s7] sm:$0xff]  ;;  %p479_p13 = pnand %p478_p12, %p602_p4  ;;  %p483_p2 = scmp.lt.s32.totalorder %s481_s4, %s477_s15 }
  0x19   : > { %v395_v4 = vmul.f32 -1.442695, %v228_v3 }
  0x1a   : > { %p480_p0 = pneg %p479_p13  ;;  %p484_p3 = por %p483_p2, %p482_p1 }
  0x1b   : > { %457 = vpow2.f32 %v395_v4 }
  0x1c   : > { %p485_p5 = pnand %p484_p3, %p480_p0 }
  0x1e   : > { %258 = vperm.xlu0 %456, %v230_v2  }
  0x21   : > { %v458_v5 = vpop.eup %457 }
  0x22   : > { %v234_v6 = vadd.f32 1.0, %v458_v5 }
  0x24   : > { %459 = vrcp.f32 %v234_v6  ;;  %vm240_vm0 = vweird.f32 %v234_v6  ;;  %v246_v11 = vand.u32 2147483648, %v234_v6  ;;  %v244_v13 = vand.u32 2147483647, %v234_v6 }
  0x26   : > { %v247_v15 = vor.u32 1.1754944e-38, %v246_v11  ;;  %vm245_vm3 = vcmp.eq.f32.partialorder %v244_v13, 8.507059e+37 }
  0x2a   : > { %v460_v7 = vpop.eup %459 }
  0x2b   : > { %v236_v8 = vmul.f32 %v460_v7, %v234_v6  ;;  %vm241_vm1 = vweird.f32 %v460_v7 }
  0x2c   : > { %vm242_vm2 = vmor %vm240_vm0, %vm241_vm1 }
  0x2d   : > { %v237_v9 = vsub.f32 1.0, %v236_v8 }
  0x2f   : > { %v238_v10 = vmul.f32 %v460_v7, %v237_v9 }
  0x31   : > { %v239_v12 = vadd.f32 %v460_v7, %v238_v10 }
  0x33   : > { %v243_v16 = vsel %vm242_vm2, %v460_v7, %v239_v12 }
  0x34   : > { %v248_v17 = vsel %vm245_vm3, %v247_v15, %v243_v16 }
  0x88   : > { %v253_v14 = vpop.permute.xlu0 %252 }
  0x89   : > { %v255_v18 = vmul.f32 %v253_v14, %v248_v17 }
  0x90   : > { %v259_v19 = vpop.permute.xlu0 %258 }
  0x91   : > { %v261_v20 = vadd.f32 %v259_v19, %v255_v18 }
  0x93   : > { %262 = vst [vmem:[%s211_s21] sm:$0xff] %v261_v20 }
  0x94   : > { %488 = shalt.err (!%p485_p5)
}
  0x95   : > { %400 = dma.vmem_to_hbm [thread:$0]  (%p602_p4), %s279_s23, 128, %s281_s26, %s264_s27  }
  0x96 PF: > { %p406_p6 = scmp.ge.s32.totalorder %s539_s17, 2  ;;  %s292_s7 = sand.u32 1, %s519_s12  }
  0x97   : > { %s293_s8 = scalar_lea.sflag [#allocation3], %s292_s7 }
  0x98   : > { %p403_p7 = pnand %p406_p6, %p609_p8 }
  0x9a   : > { %p404_p9 = pneg %p403_p7 }
  0x9c   : > { %514 = dma.done.wait (%p404_p9), %s293_s8, 128  }
  0x9d   : > { %516 = vsyncadd (%p404_p9), %s293_s8, 4294967168  ;;  %s16_s17 = sadd.s32 1, %s539_s17   ;;  %s671_s12 = smov %s523_s13 }
  0x9e   : > { %p13_p10 = scmp.ge.s32.totalorder %s16_s17, 4   ;;  %s672_s13 = smov %s527_s14 }
  0x9f   : > { %s673_s14 = smov %s615_s25  ;;  %s674_s15 = smov %s535_s16 }
  0xa0   : > { %s675_s16 = smov %s677_s20  ;;  %15 = sbr.rel (!%p13_p10) target bundleno = 4 (0x4), region = 73 }
  0xa5   :  { %299 = vsyncpa [#allocation3], 1 }
  0xa6   :  { %301 = vsyncpa [#allocation3 + $0x1], 1 }

</bundles_post_ra>
